<compile_context>
chip_gen: v6e
topology: v6e:2x2x1
jax: 0.10.0
libtpu: 0.0.40
codegen_flags: <defaults>
</compile_context>

<pallas_src>
import functools

import jax
import jax.numpy as jnp
import numpy as np
from jax import lax
from jax.experimental import pallas as pl
from jax.experimental.pallas import tpu as pltpu

N_EMBD = 16
BLOCK_SIZE = 4
N_HEAD = 6
HEAD_SIZE = N_EMBD // N_HEAD       # = 2 (Block derives head_size from n_embd // n_head)
NHS = N_HEAD * HEAD_SIZE           # = 12 (concatenated head width)
HIDDEN = 4 * N_EMBD                # = 64
LN_EPS = 1e-5

# Packed parameter-slab layout (all blocks left-aligned at lane 0, zero padded).
_COLS = 64
_ROW_WQKV = 0      # rows   0:16  -> [wq * C**-0.5 | wk | wv]   (16, 36)
_ROW_WP = 16       # rows  16:28  -> w_proj (12, 16), region padded to 16 rows
_ROW_W1 = 32       # rows  32:48  -> w1 (16, 64)
_ROW_W2 = 48       # rows  48:112 -> w2 (64, 16)
_ROW_VEC = 112     # rows 112:119 -> ln1_g, ln1_b, ln2_g, ln2_b, b_proj, b1, b2
_ROW_MASKS = 120   # rows 120:120+nhbt       -> head mask (0/1), cols 0:12
                   # rows 120+nhbt:120+2nhbt -> causal/batch additive bias, cols 0:bt


def _layernorm(z, gamma, beta):
    mu = jnp.mean(z, axis=-1, keepdims=True)
    var = jnp.mean((z - mu) ** 2, axis=-1, keepdims=True)
    return (z - mu) * lax.rsqrt(var + LN_EPS) * gamma + beta


def block_kernel(x_ref, w_ref, o_ref, *, bt):
    x = x_ref[...]                                   # (B*T, C) float32
    C = N_EMBD
    nhbt = N_HEAD * bt

    # ---- unpack packed parameter slab (static slices, all at lane offset 0) ----
    ln1_g = w_ref[_ROW_VEC + 0:_ROW_VEC + 1, 0:C]
    ln1_b = w_ref[_ROW_VEC + 1:_ROW_VEC + 2, 0:C]
    ln2_g = w_ref[_ROW_VEC + 2:_ROW_VEC + 3, 0:C]
    ln2_b = w_ref[_ROW_VEC + 3:_ROW_VEC + 4, 0:C]
    b_proj = w_ref[_ROW_VEC + 4:_ROW_VEC + 5, 0:C]
    b1 = w_ref[_ROW_VEC + 5:_ROW_VEC + 6, 0:HIDDEN]
    b2 = w_ref[_ROW_VEC + 6:_ROW_VEC + 7, 0:C]

    wqkv = w_ref[_ROW_WQKV:_ROW_WQKV + C, 0:3 * NHS]     # (C, 36), Q cols pre-scaled
    wp = w_ref[_ROW_WP:_ROW_WP + NHS, 0:C]               # (12, C)
    w1 = w_ref[_ROW_W1:_ROW_W1 + C, 0:HIDDEN]            # (C, 64)
    w2 = w_ref[_ROW_W2:_ROW_W2 + HIDDEN, 0:C]            # (64, C)

    # Precomputed masks (stored in the slab; no runtime iota / div / mod).
    head_mask = w_ref[_ROW_MASKS:_ROW_MASKS + nhbt, 0:NHS]                   # (nhbt, 12)
    att_bias = w_ref[_ROW_MASKS + nhbt:_ROW_MASKS + 2 * nhbt, 0:bt]          # (nhbt, bt)

    # ---------------- self-attention branch ----------------
    h1 = _layernorm(x, ln1_g, ln1_b)                      # (BT, C)
    qkv = jnp.dot(h1, wqkv, preferred_element_type=jnp.float32)   # fused QKV (BT, 36)
    q = qkv[:, 0:NHS]            # already scaled by C**-0.5 (folded into weights)
    k = qkv[:, NHS:2 * NHS]
    v = qkv[:, 2 * NHS:3 * NHS]

    # All heads at once: row block h of q_big holds q masked to head h's columns,
    # so one (NH*BT, NHS) x (NHS, BT) contraction yields every head's score matrix
    # stacked along the sublane axis (no per-head loop, no width-2 slices).
    q_big = jnp.concatenate([q] * N_HEAD, axis=0) * head_mask       # (NH*BT, NHS)
    s = lax.dot_general(q_big, k, (((1,), (1,)), ((), ())),
                        preferred_element_type=jnp.float32) + att_bias   # (NH*BT, BT)

    s = s - jnp.max(s, axis=-1, keepdims=True)
    e = jnp.exp(s)
    p = e * pl.reciprocal(jnp.sum(e, axis=-1, keepdims=True), approx=True)

    # per-head context, still stacked along rows: (NH*BT, NHS)
    ctx = jnp.dot(p, v, preferred_element_type=jnp.float32) * head_mask
    # balanced add-tree over head blocks -> concat(head outputs) in (BT, NHS)
    blocks = [ctx[h * bt:(h + 1) * bt, :] for h in range(N_HEAD)]
    while len(blocks) > 1:
        nxt = [blocks[i] + blocks[i + 1] for i in range(0, len(blocks) - 1, 2)]
        if len(blocks) % 2:
            nxt.append(blocks[-1])
        blocks = nxt
    cat = blocks[0]

    sa = jnp.dot(cat, wp, preferred_element_type=jnp.float32) + b_proj
    x = x + sa                                                  # first residual

    # ---------------- feed-forward branch ----------------
    h2 = _layernorm(x, ln2_g, ln2_b)
    ff = jnp.dot(h2, w1, preferred_element_type=jnp.float32) + b1
    ff = jnp.maximum(ff, 0.0)                                   # ReLU
    ff = jnp.dot(ff, w2, preferred_element_type=jnp.float32) + b2

    o_ref[...] = (x + ff).astype(o_ref.dtype)                   # second residual


def pack_params(params, batch, seq_len):
    """One-time (host-side numpy) packing of parameters + masks into a single slab."""
    bt = batch * seq_len
    nhbt = N_HEAD * bt
    rows = _ROW_MASKS + 2 * nhbt
    rows = ((rows + 7) // 8) * 8
    slab = np.zeros((rows, _COLS), np.float32)

    scale = N_EMBD ** (-0.5)   # folded attention scale (matches reference's C**-0.5)
    slab[_ROW_WQKV:_ROW_WQKV + N_EMBD, 0:NHS] = np.asarray(params["wq"]) * scale
    slab[_ROW_WQKV:_ROW_WQKV + N_EMBD, NHS:2 * NHS] = np.asarray(params["wk"])
    slab[_ROW_WQKV:_ROW_WQKV + N_EMBD, 2 * NHS:3 * NHS] = np.asarray(params["wv"])
    slab[_ROW_WP:_ROW_WP + NHS, 0:N_EMBD] = np.asarray(params["w_proj"])
    slab[_ROW_W1:_ROW_W1 + N_EMBD, 0:HIDDEN] = np.asarray(params["w1"])
    slab[_ROW_W2:_ROW_W2 + HIDDEN, 0:N_EMBD] = np.asarray(params["w2"])

    vec_rows = ["ln1_g", "ln1_b", "ln2_g", "ln2_b", "b_proj", "b1", "b2"]
    for i, name in enumerate(vec_rows):
        vals = np.asarray(params[name]).reshape(-1)
        slab[_ROW_VEC + i, 0:vals.shape[0]] = vals

    # head-block mask: row block h selects head h's columns
    r = np.arange(nhbt)
    hm = (r[:, None] // bt == (np.arange(NHS)[None, :] // HEAD_SIZE)).astype(np.float32)
    slab[_ROW_MASKS:_ROW_MASKS + nhbt, 0:NHS] = hm

    # causal + same-batch-element additive bias (identical for every head block)
    ri = r[:, None] % bt
    cj = np.arange(bt)[None, :]
    keep = (cj <= ri) & ((ri // seq_len) == (cj // seq_len))
    slab[_ROW_MASKS + nhbt:_ROW_MASKS + 2 * nhbt, 0:bt] = np.where(
        keep, 0.0, -1e30).astype(np.float32)

    return jnp.asarray(slab)


@jax.jit
def block_forward(x, slab):
    """x: (B, T, C) float32.  slab: packed parameters from pack_params (same B, T)."""
    B, T, C = x.shape
    x2d = x.reshape(B * T, C)        # whole batch as one (8, 16) slab

    kernel = functools.partial(block_kernel, bt=B * T)
    out = pl.pallas_call(
        kernel,
        out_shape=jax.ShapeDtypeStruct((B * T, C), jnp.float32),
        # No grid: single invocation, whole arrays resident in VMEM, 2 input DMAs.
        in_specs=[
            pl.BlockSpec(memory_space=pltpu.MemorySpace.VMEM),
            pl.BlockSpec(memory_space=pltpu.MemorySpace.VMEM),
        ],
        out_specs=pl.BlockSpec(memory_space=pltpu.MemorySpace.VMEM),
    )(x2d, slab)
    return out.reshape(B, T, C)


def init_params(key):
    ks = jax.random.split(key, 12)
    dev = lambda k, shape, scale=0.1: (scale * jax.random.normal(k, shape)).astype(jnp.float32)
    H = NHS  # 12
    return {
        # LayerNorms (gamma around 1, beta small)
        "ln1_g": 1.0 + dev(ks[0], (1, N_EMBD), 0.05),
        "ln1_b": dev(ks[1], (1, N_EMBD), 0.05),
        "ln2_g": 1.0 + dev(ks[2], (1, N_EMBD), 0.05),
        "ln2_b": dev(ks[3], (1, N_EMBD), 0.05),
        # per-head K/Q/V (no bias), stacked along output dim: (n_embd, n_head*head_size)
        "wq": dev(ks[4], (N_EMBD, H)),
        "wk": dev(ks[5], (N_EMBD, H)),
        "wv": dev(ks[6], (N_EMBD, H)),
        # output projection (head_size*n_head -> n_embd)
        "w_proj": dev(ks[7], (H, N_EMBD)),
        "b_proj": dev(ks[8], (1, N_EMBD)),
        # FFN
        "w1": dev(ks[9], (N_EMBD, HIDDEN)),
        "b1": dev(ks[10], (1, HIDDEN)),
        "w2": dev(ks[11], (HIDDEN, N_EMBD)),
        "b2": jnp.zeros((1, N_EMBD), jnp.float32),
    }


def block_reference(x, p):
    """Pure-JAX reference of the same forward (eval mode)."""
    def ln(z, g, b):
        mu = jnp.mean(z, axis=-1, keepdims=True)
        var = jnp.mean((z - mu) ** 2, axis=-1, keepdims=True)
        return (z - mu) * lax.rsqrt(var + LN_EPS) * g + b

    B, T, C = x.shape
    h1 = ln(x, p["ln1_g"], p["ln1_b"])
    q = h1 @ p["wq"]
    k = h1 @ p["wk"]
    v = h1 @ p["wv"]
    scale = C ** (-0.5)
    tril = jnp.tril(jnp.ones((T, T), bool))
    outs = []
    for h in range(N_HEAD):
        s, e = h * HEAD_SIZE, (h + 1) * HEAD_SIZE
        wei = jnp.einsum("btd,bsd->bts", q[..., s:e], k[..., s:e]) * scale
        wei = jnp.where(tril, wei, -jnp.inf)
        wei = jax.nn.softmax(wei, axis=-1)
        outs.append(jnp.einsum("bts,bsd->btd", wei, v[..., s:e]))
    sa = jnp.concatenate(outs, axis=-1) @ p["w_proj"] + p["b_proj"]
    x = x + sa
    h2 = ln(x, p["ln2_g"], p["ln2_b"])
    ff = jax.nn.relu(h2 @ p["w1"] + p["b1"]) @ p["w2"] + p["b2"]
    return x + ff


if __name__ == "__main__":
    key = jax.random.PRNGKey(0)
    k_x, k_p = jax.random.split(key)

    B, T, C = 2, BLOCK_SIZE, N_EMBD          # (2, 4, 16)
    x = jax.random.normal(k_x, (B, T, C), dtype=jnp.float32)
    params = init_params(k_p)

    # One-time parameter packing (hoisted out of the forward path).
    slab = pack_params(params, B, T)

    out = jax.block_until_ready(block_forward(x, slab))
    ref = jax.block_until_ready(block_reference(x, params))
    np.testing.assert_allclose(np.asarray(out), np.asarray(ref),
                               atol=5e-3, rtol=5e-3)

    print("KERNEL_OK")
</pallas_src>

<mosaic_0001>
module attributes {stable_mosaic.version = 11 : i64} {
  func.func @block_kernel(%arg0: memref<8x16xf32, #tpu.memory_space<vmem>>, %arg1: memref<216x64xf32, #tpu.memory_space<vmem>>, %arg2: memref<8x16xf32, #tpu.memory_space<vmem>>) attributes {dimension_semantics = [], scalar_prefetch = 0 : i64, scratch_operands = 0 : i64, tpu.core_type = #tpu.core_type<tc>} {
    %c0 = arith.constant 0 : index
    %c0_0 = arith.constant 0 : index
    %0 = vector.load %arg0[%c0, %c0_0] : memref<8x16xf32, #tpu.memory_space<vmem>>, vector<8x16xf32>
    %c112 = arith.constant 112 : index
    %c0_1 = arith.constant 0 : index
    %1 = vector.load %arg1[%c112, %c0_1] : memref<216x64xf32, #tpu.memory_space<vmem>>, vector<1x16xf32>
    %c113 = arith.constant 113 : index
    %c0_2 = arith.constant 0 : index
    %2 = vector.load %arg1[%c113, %c0_2] : memref<216x64xf32, #tpu.memory_space<vmem>>, vector<1x16xf32>
    %c114 = arith.constant 114 : index
    %c0_3 = arith.constant 0 : index
    %3 = vector.load %arg1[%c114, %c0_3] : memref<216x64xf32, #tpu.memory_space<vmem>>, vector<1x16xf32>
    %c115 = arith.constant 115 : index
    %c0_4 = arith.constant 0 : index
    %4 = vector.load %arg1[%c115, %c0_4] : memref<216x64xf32, #tpu.memory_space<vmem>>, vector<1x16xf32>
    %c116 = arith.constant 116 : index
    %c0_5 = arith.constant 0 : index
    %5 = vector.load %arg1[%c116, %c0_5] : memref<216x64xf32, #tpu.memory_space<vmem>>, vector<1x16xf32>
    %c117 = arith.constant 117 : index
    %c0_6 = arith.constant 0 : index
    %6 = vector.load %arg1[%c117, %c0_6] : memref<216x64xf32, #tpu.memory_space<vmem>>, vector<1x64xf32>
    %c118 = arith.constant 118 : index
    %c0_7 = arith.constant 0 : index
    %7 = vector.load %arg1[%c118, %c0_7] : memref<216x64xf32, #tpu.memory_space<vmem>>, vector<1x16xf32>
    %c0_8 = arith.constant 0 : index
    %c0_9 = arith.constant 0 : index
    %8 = vector.load %arg1[%c0_8, %c0_9] : memref<216x64xf32, #tpu.memory_space<vmem>>, vector<16x36xf32>
    %c16 = arith.constant 16 : index
    %c0_10 = arith.constant 0 : index
    %9 = vector.load %arg1[%c16, %c0_10] : memref<216x64xf32, #tpu.memory_space<vmem>>, vector<12x16xf32>
    %c32 = arith.constant 32 : index
    %c0_11 = arith.constant 0 : index
    %10 = vector.load %arg1[%c32, %c0_11] : memref<216x64xf32, #tpu.memory_space<vmem>>, vector<16x64xf32>
    %c48 = arith.constant 48 : index
    %c0_12 = arith.constant 0 : index
    %11 = vector.load %arg1[%c48, %c0_12] : memref<216x64xf32, #tpu.memory_space<vmem>>, vector<64x16xf32>
    %c120 = arith.constant 120 : index
    %c0_13 = arith.constant 0 : index
    %12 = vector.load %arg1[%c120, %c0_13] : memref<216x64xf32, #tpu.memory_space<vmem>>, vector<48x12xf32>
    %c168 = arith.constant 168 : index
    %c0_14 = arith.constant 0 : index
    %13 = vector.load %arg1[%c168, %c0_14] : memref<216x64xf32, #tpu.memory_space<vmem>>, vector<48x8xf32>
    %cst = arith.constant dense<0.000000e+00> : vector<8xf32>
    %14 = vector.multi_reduction <add>, %0, %cst [1] : vector<8x16xf32> to vector<8xf32>
    %15 = vector.shape_cast %14 : vector<8xf32> to vector<8x1xf32>
    %cst_15 = arith.constant 1.600000e+01 : f32
    %16 = vector.broadcast %cst_15 : f32 to vector<8x1xf32>
    %17 = arith.divf %15, %16 : vector<8x1xf32>
    %18 = vector.broadcast %17 : vector<8x1xf32> to vector<8x16xf32>
    %19 = arith.subf %0, %18 : vector<8x16xf32>
    %20 = arith.mulf %19, %19 : vector<8x16xf32>
    %cst_16 = arith.constant dense<0.000000e+00> : vector<8xf32>
    %21 = vector.multi_reduction <add>, %20, %cst_16 [1] : vector<8x16xf32> to vector<8xf32>
    %22 = vector.shape_cast %21 : vector<8xf32> to vector<8x1xf32>
    %cst_17 = arith.constant 1.600000e+01 : f32
    %23 = vector.broadcast %cst_17 : f32 to vector<8x1xf32>
    %24 = arith.divf %22, %23 : vector<8x1xf32>
    %25 = vector.broadcast %17 : vector<8x1xf32> to vector<8x16xf32>
    %26 = arith.subf %0, %25 : vector<8x16xf32>
    %cst_18 = arith.constant 9.99999974E-6 : f32
    %27 = vector.broadcast %cst_18 : f32 to vector<8x1xf32>
    %28 = arith.addf %24, %27 : vector<8x1xf32>
    %29 = math.rsqrt %28 : vector<8x1xf32>
    %30 = vector.broadcast %29 : vector<8x1xf32> to vector<8x16xf32>
    %31 = arith.mulf %26, %30 : vector<8x16xf32>
    %32 = vector.broadcast %1 : vector<1x16xf32> to vector<8x16xf32>
    %33 = arith.mulf %31, %32 : vector<8x16xf32>
    %34 = vector.broadcast %2 : vector<1x16xf32> to vector<8x16xf32>
    %35 = arith.addf %33, %34 : vector<8x16xf32>
    %cst_19 = arith.constant dense<0.000000e+00> : vector<8x36xf32>
    %36 = tpu.matmul %35, %8, %cst_19 {dimension_numbers = #tpu.dot_dimension_numbers<[1], [0], [0], [1], [0, 0, 1, 1], [], []>} : vector<8x16xf32>, vector<16x36xf32>, vector<8x36xf32> -> vector<8x36xf32>
    %37 = vector.extract_strided_slice %36 {offsets = [0, 0], sizes = [8, 12], strides = [1, 1]} : vector<8x36xf32> to vector<8x12xf32>
    %38 = vector.extract_strided_slice %36 {offsets = [0, 12], sizes = [8, 12], strides = [1, 1]} : vector<8x36xf32> to vector<8x12xf32>
    %39 = vector.extract_strided_slice %36 {offsets = [0, 24], sizes = [8, 12], strides = [1, 1]} : vector<8x36xf32> to vector<8x12xf32>
    %40 = tpu.concatenate %37, %37, %37, %37, %37, %37 in 0 : vector<8x12xf32>, vector<8x12xf32>, vector<8x12xf32>, vector<8x12xf32>, vector<8x12xf32>, vector<8x12xf32> -> vector<48x12xf32>
    %41 = arith.mulf %40, %12 : vector<48x12xf32>
    %cst_20 = arith.constant dense<0.000000e+00> : vector<48x8xf32>
    %42 = tpu.matmul %41, %38, %cst_20 {dimension_numbers = #tpu.dot_dimension_numbers<[1], [1], [0], [0], [0, 0, 1, 0], [], []>} : vector<48x12xf32>, vector<8x12xf32>, vector<48x8xf32> -> vector<48x8xf32>
    %43 = arith.addf %42, %13 : vector<48x8xf32>
    %cst_21 = arith.constant dense<0xFF800000> : vector<48xf32>
    %44 = vector.multi_reduction <maximumf>, %43, %cst_21 [1] : vector<48x8xf32> to vector<48xf32>
    %45 = vector.shape_cast %44 : vector<48xf32> to vector<48x1xf32>
    %46 = vector.broadcast %45 : vector<48x1xf32> to vector<48x8xf32>
    %47 = arith.subf %43, %46 : vector<48x8xf32>
    %48 = math.exp %47 : vector<48x8xf32>
    %cst_22 = arith.constant dense<0.000000e+00> : vector<48xf32>
    %49 = vector.multi_reduction <add>, %48, %cst_22 [1] : vector<48x8xf32> to vector<48xf32>
    %50 = vector.shape_cast %49 : vector<48xf32> to vector<48x1xf32>
    %51 = tpu.reciprocal %50 {approx = true} : vector<48x1xf32> -> vector<48x1xf32>
    %52 = vector.broadcast %51 : vector<48x1xf32> to vector<48x8xf32>
    %53 = arith.mulf %48, %52 : vector<48x8xf32>
    %cst_23 = arith.constant dense<0.000000e+00> : vector<48x12xf32>
    %54 = tpu.matmul %53, %39, %cst_23 {dimension_numbers = #tpu.dot_dimension_numbers<[1], [0], [0], [1], [0, 0, 1, 1], [], []>} : vector<48x8xf32>, vector<8x12xf32>, vector<48x12xf32> -> vector<48x12xf32>
    %55 = arith.mulf %54, %12 : vector<48x12xf32>
    %56 = vector.extract_strided_slice %55 {offsets = [0, 0], sizes = [8, 12], strides = [1, 1]} : vector<48x12xf32> to vector<8x12xf32>
    %57 = vector.extract_strided_slice %55 {offsets = [8, 0], sizes = [8, 12], strides = [1, 1]} : vector<48x12xf32> to vector<8x12xf32>
    %58 = vector.extract_strided_slice %55 {offsets = [16, 0], sizes = [8, 12], strides = [1, 1]} : vector<48x12xf32> to vector<8x12xf32>
    %59 = vector.extract_strided_slice %55 {offsets = [24, 0], sizes = [8, 12], strides = [1, 1]} : vector<48x12xf32> to vector<8x12xf32>
    %60 = vector.extract_strided_slice %55 {offsets = [32, 0], sizes = [8, 12], strides = [1, 1]} : vector<48x12xf32> to vector<8x12xf32>
    %61 = vector.extract_strided_slice %55 {offsets = [40, 0], sizes = [8, 12], strides = [1, 1]} : vector<48x12xf32> to vector<8x12xf32>
    %62 = arith.addf %56, %57 : vector<8x12xf32>
    %63 = arith.addf %58, %59 : vector<8x12xf32>
    %64 = arith.addf %60, %61 : vector<8x12xf32>
    %65 = arith.addf %62, %63 : vector<8x12xf32>
    %66 = arith.addf %65, %64 : vector<8x12xf32>
    %cst_24 = arith.constant dense<0.000000e+00> : vector<8x16xf32>
    %67 = tpu.matmul %66, %9, %cst_24 {dimension_numbers = #tpu.dot_dimension_numbers<[1], [0], [0], [1], [0, 0, 1, 1], [], []>} : vector<8x12xf32>, vector<12x16xf32>, vector<8x16xf32> -> vector<8x16xf32>
    %68 = vector.broadcast %5 : vector<1x16xf32> to vector<8x16xf32>
    %69 = arith.addf %67, %68 : vector<8x16xf32>
    %70 = arith.addf %0, %69 : vector<8x16xf32>
    %cst_25 = arith.constant dense<0.000000e+00> : vector<8xf32>
    %71 = vector.multi_reduction <add>, %70, %cst_25 [1] : vector<8x16xf32> to vector<8xf32>
    %72 = vector.shape_cast %71 : vector<8xf32> to vector<8x1xf32>
    %cst_26 = arith.constant 1.600000e+01 : f32
    %73 = vector.broadcast %cst_26 : f32 to vector<8x1xf32>
    %74 = arith.divf %72, %73 : vector<8x1xf32>
    %75 = vector.broadcast %74 : vector<8x1xf32> to vector<8x16xf32>
    %76 = arith.subf %70, %75 : vector<8x16xf32>
    %77 = arith.mulf %76, %76 : vector<8x16xf32>
    %cst_27 = arith.constant dense<0.000000e+00> : vector<8xf32>
    %78 = vector.multi_reduction <add>, %77, %cst_27 [1] : vector<8x16xf32> to vector<8xf32>
    %79 = vector.shape_cast %78 : vector<8xf32> to vector<8x1xf32>
    %cst_28 = arith.constant 1.600000e+01 : f32
    %80 = vector.broadcast %cst_28 : f32 to vector<8x1xf32>
    %81 = arith.divf %79, %80 : vector<8x1xf32>
    %82 = vector.broadcast %74 : vector<8x1xf32> to vector<8x16xf32>
    %83 = arith.subf %70, %82 : vector<8x16xf32>
    %cst_29 = arith.constant 9.99999974E-6 : f32
    %84 = vector.broadcast %cst_29 : f32 to vector<8x1xf32>
    %85 = arith.addf %81, %84 : vector<8x1xf32>
    %86 = math.rsqrt %85 : vector<8x1xf32>
    %87 = vector.broadcast %86 : vector<8x1xf32> to vector<8x16xf32>
    %88 = arith.mulf %83, %87 : vector<8x16xf32>
    %89 = vector.broadcast %3 : vector<1x16xf32> to vector<8x16xf32>
    %90 = arith.mulf %88, %89 : vector<8x16xf32>
    %91 = vector.broadcast %4 : vector<1x16xf32> to vector<8x16xf32>
    %92 = arith.addf %90, %91 : vector<8x16xf32>
    %cst_30 = arith.constant dense<0.000000e+00> : vector<8x64xf32>
    %93 = tpu.matmul %92, %10, %cst_30 {dimension_numbers = #tpu.dot_dimension_numbers<[1], [0], [0], [1], [0, 0, 1, 1], [], []>} : vector<8x16xf32>, vector<16x64xf32>, vector<8x64xf32> -> vector<8x64xf32>
    %94 = vector.broadcast %6 : vector<1x64xf32> to vector<8x64xf32>
    %95 = arith.addf %93, %94 : vector<8x64xf32>
    %cst_31 = arith.constant 0.000000e+00 : f32
    %96 = vector.broadcast %cst_31 : f32 to vector<8x64xf32>
    %97 = arith.maximumf %95, %96 : vector<8x64xf32>
    %cst_32 = arith.constant dense<0.000000e+00> : vector<8x16xf32>
    %98 = tpu.matmul %97, %11, %cst_32 {dimension_numbers = #tpu.dot_dimension_numbers<[1], [0], [0], [1], [0, 0, 1, 1], [], []>} : vector<8x64xf32>, vector<64x16xf32>, vector<8x16xf32> -> vector<8x16xf32>
    %99 = vector.broadcast %7 : vector<1x16xf32> to vector<8x16xf32>
    %100 = arith.addf %98, %99 : vector<8x16xf32>
    %101 = arith.addf %70, %100 : vector<8x16xf32>
    %c0_33 = arith.constant 0 : index
    %c0_34 = arith.constant 0 : index
    %102 = vector.load %arg2[%c0_33, %c0_34] : memref<8x16xf32, #tpu.memory_space<vmem>>, vector<8x16xf32>
    tpu.vector_store %arg2[%c0_33, %c0_34], %101 {strides = array<i32>} : memref<8x16xf32, #tpu.memory_space<vmem>>, vector<8x16xf32>,
    return
  }
}

</mosaic_0001>

<bundles_post_ra>
// kernel: block_forward.1
= control target key start
LH: loop header
LB: loop body
LE: loop exit
PB: predicated region body
PF: predicated region fallthrough
CT: control target
= control target key end

     0   :  { %vm46_vm0 = vcmask 130048   ;;  %s1134_s0 = inlined_call_operand.vmem [shape: f32[8,16], index: 0, kind: input, shape index: {}]   ;;  %s1135_s1 = inlined_call_operand.vmem [shape: f32[216,64], index: 1, kind: input, shape index: {}]   ;;  %s1136_s2 = inlined_call_operand.hbm [shape: f32[8,16], index: 2, kind: output, shape index: {}]  }
   0x1   :  { %v937_v0 = vld [vmem:[%s1134_s0] sm:$0xff] }
   0x2   :  { %7 = vsyncpa [#allocation3], 0  ;;  %v47_v1 = vsel %vm46_vm0, %v937_v0, 0.0  ;;  %v21_v7 = vld [vmem:[%s1135_s1 + $0x8] sm:$0xff]  ;;  %v914_v8 = vmov 0.0   ;;  %v20_v9 = vld [vmem:[%s1135_s1] sm:$0xff] }
   0x3   :  { %48 = vadd.xlane.f32.xlu0 %v47_v1  ;;  %797 = vmatprep.subr.mxu0 %v914_v8  ;;  %vm915_vm1 = vmmov 0   ;;  %v740_v14 = vld [vmem:[%s1135_s1 + $0x70] ss:$0 sm:$0xff]  ;;  %v741_v16 = vld [vmem:[%s1135_s1 + $0x71] ss:$0 sm:$0xff]  ;;  %v963_v19 = vld [vmem:[%s1135_s1 + $0x78] sm:$0xff] }
   0x4   :  { %801 = vmatprep.mubr.msk.f32.mxu0 %vm915_vm1, %v914_v8  ;;  %798 = vmatpush3.msra.mxu0 %v21_v7  ;;  %vm153_vm2 = vcmask 97280   ;;  %s916_s20 = smov 116   ;;  %v974_v24 = vld [vmem:[%s1135_s1 + $0x80] sm:$0xff]  ;;  %v980_v25 = vld [vmem:[%s1135_s1 + $0x88] sm:$0xff]  ;;  %v991_v28 = vld [vmem:[%s1135_s1 + $0x90] sm:$0xff]  ;;  %vm269_vm3 = vcmask 64512  }
   0x5   :  { %799 = vmatprep.subr.mxu0 %v914_v8  ;;  %v997_v29 = vld [vmem:[%s1135_s1 + $0x98] sm:$0xff]  ;;  %v1007_v32 = vld [vmem:[%s1135_s1 + $0xa0] sm:$0xff]  ;;  %v41_v34 = vld [vmem:[%s1135_s1 + $0xb0] sm:$0xff]  ;;  %s917_s14 = smov 104   ;;  %vm470_vm4 = vcmask 1043456   ;;  %vm650_vm5 = vcmask 523264  }
   0x6   :  { %800 = vmatpush3.msra.mxu0 %v20_v9  ;;  %v40_v36 = vld [vmem:[%s1135_s1 + $0xa8] sm:$0xff]  ;;  %v43_v39 = vld [vmem:[%s1135_s1 + $0xc0] sm:$0xff]  ;;  %v42_v43 = vld [vmem:[%s1135_s1 + $0xb8] sm:$0xff] }
   0x7   :  { %v44_v50 = vld [vmem:[%s1135_s1 + $0xc8] sm:$0xff]  ;;  %v45_v54 = vld [vmem:[%s1135_s1 + $0xd0] sm:$0xff] }
  0x8c   :  { %v49_v2 = vpop.xlane.xlu0 %48 }
  0x8d   :  { %v51_v3 = vmul.f32 0.0625, %v49_v2 }
  0x8f   :  { %v52_v4 = vsub.f32 %v937_v0, %v51_v3 }
  0x91   :  { %v53_v5 = vmul.f32 %v52_v4, %v52_v4 }
  0x93   :  { %v54_v6 = vsel %vm46_vm0, %v53_v5, 0.0 }
  0x94   :  { %55 = vadd.xlane.f32.xlu0 %v54_v6 }
 0x11d   :  { %v56_v10 = vpop.xlane.xlu0 %55 }
 0x11e   :  { %v57_v11 = vmul.f32 0.0625, %v56_v10 }
 0x120   :  { %v58_v12 = vadd.f32 1e-05, %v57_v11 }
 0x122   :  { %864 = vrsqrt.f32 %v58_v12 }
 0x12f   :  { %v865_v13 = vpop.eup %864 }
 0x130   :  { %v60_v15 = vmul.f32 %v865_v13, %v52_v4 }
 0x132   :  { %v65_v17 = vmul.f32 %v740_v14, %v60_v15 }
 0x134   :  { %v70_v18 = vadd.f32 %v741_v16, %v65_v17 }
 0x136   :  { %802 = vmatmul.mubr.msk.f32.vlgmr.msra.gmra.mxu0 %vm46_vm0, %v70_v18 }
 0x1f6   :  { %v965_v20 = vpop.f32.mrf.mxu0 }
 0x1f7   :  { %151 = vrot.lane.b32.xlu1 %v965_v20, %s916_s20  ;;  %v144_v21 = vmul.f32 %v965_v20, %v963_v19  ;;  %v145_v26 = vmul.f32 %v965_v20, %v974_v24  ;;  %v146_v27 = vmul.f32 %v965_v20, %v980_v25  ;;  %v147_v30 = vmul.f32 %v965_v20, %v991_v28  ;;  %s918_s20 = smov [#allocation2]  }
 0x1f8   :  { %v803_v22 = vpop.f32.mrf.mxu0  ;;  %v148_v31 = vmul.f32 %v965_v20, %v997_v29  ;;  %v149_v33 = vmul.f32 %v965_v20, %v1007_v32  ;;  %s732_s21 = sshll.u32 %s918_s20, 4  ;;  %s733_s21 = int_to_ptr.vmem [resolvable:$true] %s732_s21 }
 0x1f9   :  { %806 = vmatprep.mubr.msk.f32.mxu1 %vm153_vm2, %v144_v21  ;;  %s892_s22 = scalar_lea.vmem %s733_s21, 128  ;;  %p897_p1 = scmp.lt.s32.totalorder %s733_s21, %s733_s21 }
 0x1fa   :  { %p893_p0 = scmp.ne.s32.totalorder %s733_s21, %s892_s22  ;;  %p898_p2 = scmp.lt.s32.totalorder %s892_s22, %s892_s22 }
 0x1fc   :  { %p899_p3 = por %p898_p2, %p897_p1 }
 0x1fe   :  { %p900_p4 = pnand %p899_p3, %p893_p0 }
 0x269   :  { %v152_v23 = vpop.permute.xlu1 %151 }
 0x26a   :  { %804 = vmatprep.subr.msk.mxu1 %vm153_vm2, %v152_v23 }
 0x26b   :  { %805 = vmatpush3.xpose.msk.msra.mxu1 %vm153_vm2, %v152_v23 }
 0x26c   :  { %840 = vmatprep.subr.mxu1 %v914_v8 }
 0x26e   :  { %807 = vmatmul.mubr.msk.f32.vlgmr.msra.gmra.mxu1 %vm153_vm2, %v145_v26 }
 0x26f   :  { %809 = vmatprep.mubr.msk.f32.mxu1 %vm153_vm2, %v146_v27 }
 0x272   :  { %810 = vmatmul.mubr.msk.f32.gmra.mxu1 %vm153_vm2, %v147_v30 }
 0x273   :  { %812 = vmatprep.mubr.msk.f32.mxu1 %vm153_vm2, %v148_v31 }
 0x276   :  { %813 = vmatmul.mubr.msk.f32.gmra.mxu1 %vm153_vm2, %v149_v33 }
 0x277   :  { %856 = vmatprep.mubr.msk.f32.mxu1 %vm915_vm1, %v914_v8 }
 0x32e   :  { %v808_v35 = vpop.f32.mrf.mxu1 }
 0x32f   :  { %v246_v37 = vadd.f32 %v808_v35, %v41_v34 }
 0x330   :  { %v240_v38 = vpop.f32.mrf.mxu1 }
 0x331   :  { %v241_v40 = vadd.f32 %v240_v38, %v40_v36  ;;  %v273_v41 = vsel %vm269_vm3, %v246_v37, -inf }
 0x332   :  { %274 = vmax.xlane.f32.xlu0 %v273_v41  ;;  %v811_v42 = vpop.f32.mrf.mxu1 }
 0x333   :  { %v256_v44 = vadd.f32 %v811_v42, %v43_v39  ;;  %v270_v45 = vsel %vm269_vm3, %v241_v40, -inf }
 0x334   :  { %v250_v46 = vpop.f32.mrf.mxu1  ;;  %271 = vmax.xlane.f32.xlu1 %v270_v45 }
 0x335   :  { %v251_v47 = vadd.f32 %v250_v46, %v42_v43  ;;  %v279_v48 = vsel %vm269_vm3, %v256_v44, -inf }
 0x336   :  { %280 = vmax.xlane.f32.xlu0 %v279_v48  ;;  %v814_v49 = vpop.f32.mrf.mxu1 }
 0x337   :  { %v276_v53 = vsel %vm269_vm3, %v251_v47, -inf  ;;  %v266_v55 = vadd.f32 %v814_v49, %v45_v54 }
 0x338   :  { %v260_v51 = vpop.f32.mrf.mxu1 }
 0x339   :  { %v261_v52 = vadd.f32 %v260_v51, %v44_v50  ;;  %v285_v57 = vsel %vm269_vm3, %v266_v55, -inf  ;;  %v23_v51 = vld [vmem:[%s1135_s1 + $0x18] sm:$0xf] }
 0x33a   :  { %277 = vmax.xlane.f32.xlu0 %v276_v53 }
 0x33b   :  { %v282_v56 = vsel %vm269_vm3, %v261_v52, -inf }
 0x33e   :  { %283 = vmax.xlane.f32.xlu0 %v282_v56 }
 0x342   :  { %286 = vmax.xlane.f32.xlu0 %v285_v57 }
 0x3bb   :  { %v275_v58 = vpop.xlane.xlu0 %274 }
 0x3bc   :  { %v289_v59 = vsub.f32 %v246_v37, %v275_v58 }
 0x3bd   :  { %v272_v60 = vpop.xlane.xlu1 %271 }
 0x3be   :  { %v296_v61 = vmul.f32 1.442695, %v289_v59  ;;  %v288_v62 = vsub.f32 %v241_v40, %v272_v60 }
 0x3bf   :  { %v281_v63 = vpop.xlane.xlu0 %280 }
 0x3c0   :  { %866 = vpow2.f32 %v296_v61  ;;  %v294_v1 = vmul.f32 1.442695, %v288_v62  ;;  %v291_v2 = vsub.f32 %v256_v44, %v281_v63 }
 0x3c2   :  { %868 = vpow2.f32 %v294_v1  ;;  %v300_v5 = vmul.f32 1.442695, %v291_v2 }
 0x3c3   :  { %v278_v3 = vpop.xlane.xlu0 %277 }
 0x3c4   :  { %v290_v4 = vsub.f32 %v251_v47, %v278_v3 }
 0x3c6   :  { %v298_v6 = vmul.f32 1.442695, %v290_v4 }
 0x3c7   :  { %v284_v7 = vpop.xlane.xlu0 %283 }
 0x3c8   :  { %870 = vpow2.f32 %v298_v6  ;;  %v292_v9 = vsub.f32 %v261_v52, %v284_v7  ;;  %v22_v52 = vld [vmem:[%s1135_s1 + $0x10] sm:$0xff] }
 0x3c9   :  { %872 = vpow2.f32 %v300_v5 }
 0x3ca   :  { %v302_v10 = vmul.f32 1.442695, %v292_v9 }
 0x3cb   :  { %v287_v11 = vpop.xlane.xlu0 %286 }
 0x3cc   :  { %874 = vpow2.f32 %v302_v10  ;;  %v293_v12 = vsub.f32 %v266_v55, %v287_v11 }
 0x3cd   :  { %v867_v13 = vpop.eup %866 }
 0x3ce   :  { %v304_v14 = vmul.f32 1.442695, %v293_v12  ;;  %v309_v15 = vsel %vm269_vm3, %v867_v13, 0.0 }
 0x3cf   :  { %v869_v16 = vpop.eup %868  ;;  %310 = vadd.xlane.f32.xlu0 %v309_v15  ;;  %v32_v15 = vld [vmem:[%s1135_s1 + $0x60] sm:$0xff] }
 0x3d0   :  { %876 = vpow2.f32 %v304_v14  ;;  %v306_v17 = vsel %vm269_vm3, %v869_v16, 0.0  ;;  %v24_v14 = vld [vmem:[%s1135_s1 + $0x20] sm:$0xff] }
 0x3d3   :  { %307 = vadd.xlane.f32.xlu0 %v306_v17  ;;  %v30_v17 = vld [vmem:[%s1135_s1 + $0x50] sm:$0xff] }
 0x3d5   :  { %v871_v18 = vpop.eup %870 }
 0x3d6   :  { %v312_v21 = vsel %vm269_vm3, %v871_v18, 0.0  ;;  %v873_v22 = vpop.eup %872 }
 0x3d7   :  { %313 = vadd.xlane.f32.xlu0 %v312_v21  ;;  %v315_v27 = vsel %vm269_vm3, %v873_v22, 0.0 }
 0x3d9   :  { %v875_v23 = vpop.eup %874 }
 0x3da   :  { %v318_v26 = vsel %vm269_vm3, %v875_v23, 0.0 }
 0x3db   :  { %319 = vadd.xlane.f32.xlu1 %v318_v26  ;;  %316 = vadd.xlane.f32.xlu0 %v315_v27  ;;  %v759_v27 = vld [vmem:[%s1135_s1 + $0x72] ss:$0 sm:$0xff] }
 0x3dd   :  { %v877_v30 = vpop.eup %876 }
 0x3de   :  { %v321_v31 = vsel %vm269_vm3, %v877_v30, 0.0 }
 0x3df   :  { %322 = vadd.xlane.f32.xlu0 %v321_v31  ;;  %v760_v31 = vld [vmem:[%s1135_s1 + $0x73] ss:$0 sm:$0xff] }
 0x3ec   :  { %336 = vrot.lane.b32.xlu1 %v965_v20, %s917_s14 }
 0x458   :  { %v311_v33 = vpop.xlane.xlu0 %310 }
 0x459   :  { %878 = vrcp.f32 %v311_v33 }
 0x45c   :  { %v308_v34 = vpop.xlane.xlu0 %307 }
 0x45d   :  { %880 = vrcp.f32 %v308_v34 }
 0x460   :  { %v314_v35 = vpop.xlane.xlu0 %313 }
 0x461   :  { %882 = vrcp.f32 %v314_v35  ;;  %v28_v35 = vld [vmem:[%s1135_s1 + $0x40] sm:$0xff] }
 0x464   :  { %v317_v36 = vpop.xlane.xlu0 %316  ;;  %v320_v37 = vpop.xlane.xlu1 %319 }
 0x465   :  { %884 = vrcp.f32 %v317_v36  ;;  %v27_v36 = vld [vmem:[%s1135_s1 + $0x38] sm:$0xff] }
 0x466   :  { %886 = vrcp.f32 %v320_v37  ;;  %v879_v40 = vpop.eup %878  ;;  %v26_v37 = vld [vmem:[%s1135_s1 + $0x30] sm:$0xff] }
 0x467   :  { %v331_v20 = vmul.f32 %v879_v40, %v867_v13  ;;  %v25_v13 = vld [vmem:[%s1135_s1 + $0x28] sm:$0xff] }
 0x468   :  { %v323_v38 = vpop.xlane.xlu0 %322  ;;  %v337_v39 = vpop.permute.xlu1 %336 }
 0x469   :  { %888 = vrcp.f32 %v323_v38  ;;  %815 = vmatprep.subr.mxu0 %v337_v39  ;;  %v761_v38 = vld [vmem:[%s1135_s1 + $0x75] ss:$0 sm:$0xff] }
 0x46a   :  { %v881_v41 = vpop.eup %880  ;;  %816 = vmatpush3.msra.mxu0 %v337_v39 }
 0x46b   :  { %v330_v42 = vmul.f32 %v881_v41, %v869_v16  ;;  %826 = vmatprep.subr.mxu0 %v914_v8  ;;  %v31_v16 = vld [vmem:[%s1135_s1 + $0x58] sm:$0xff] }
 0x46d   :  { %817 = vmatprep.mubr.msk.f32.mxu0 %vm269_vm3, %v330_v42 }
 0x46e   :  { %v883_v43 = vpop.eup %882  ;;  %818 = vmatmul.mubr.msk.f32.vlgmr.msra.gmra.mxu0 %vm269_vm3, %v331_v20  ;;  %v763_v20 = vld [vmem:[%s1135_s1 + $0x76] ss:$0 sm:$0xff] }
 0x46f   :  { %v332_v44 = vmul.f32 %v883_v43, %v871_v18  ;;  %827 = vmatpush3.msk.msra.mxu0 %vm470_vm4, %v23_v51  ;;  %v29_v18 = vld [vmem:[%s1135_s1 + $0x48] sm:$0xff] }
 0x470   :  { %828 = vmatprep.subr.mxu0 %v914_v8 }
 0x471   :  { %820 = vmatprep.mubr.msk.f32.mxu0 %vm269_vm3, %v332_v44  ;;  %829 = vmatpush3.msra.mxu0 %v22_v52 }
 0x472   :  { %v885_v45 = vpop.eup %884  ;;  %833 = vmatprep.subr.mxu0 %v914_v8 }
 0x473   :  { %v887_v46 = vpop.eup %886  ;;  %v333_v47 = vmul.f32 %v885_v45, %v873_v22 }
 0x474   :  { %v334_v48 = vmul.f32 %v887_v46, %v875_v23 }
 0x475   :  { %821 = vmatmul.mubr.msk.f32.gmra.mxu0 %vm269_vm3, %v333_v47 }
 0x476   :  { %v889_v49 = vpop.eup %888  ;;  %823 = vmatprep.mubr.msk.f32.mxu0 %vm269_vm3, %v334_v48 }
 0x477   :  { %v335_v50 = vmul.f32 %v889_v49, %v877_v30 }
 0x479   :  { %824 = vmatmul.mubr.msk.f32.gmra.mxu0 %vm269_vm3, %v335_v50 }
 0x47a   :  { %830 = vmatprep.mubr.msk.f32.mxu0 %vm915_vm1, %v914_v8 }
 0x52e   :  { %v819_v53 = vpop.f32.mrf.mxu0 }
 0x52f   :  { %v453_v61 = vmul.f32 %v819_v53, %v974_v24 }
 0x530   :  { %v423_v54 = vpop.f32.mrf.mxu0 }
 0x531   :  { %v452_v57 = vmul.f32 %v423_v54, %v963_v19  ;;  %v756_v19 = vld [vmem:[%s1135_s1 + $0x74] ss:$0 sm:$0xff] }
 0x533   :  { %v458_v1 = vadd.f32 %v453_v61, %v452_v57 }
 0x535   :  { %v822_v55 = vpop.f32.mrf.mxu0 }
 0x536   :  { %v455_v58 = vmul.f32 %v822_v55, %v991_v28 }
 0x537   :  { %v433_v56 = vpop.f32.mrf.mxu0 }
 0x538   :  { %v454_v59 = vmul.f32 %v433_v56, %v980_v25 }
 0x539   :  { %v825_v60 = vpop.f32.mrf.mxu0 }
 0x53a   :  { %v459_v62 = vadd.f32 %v455_v58, %v454_v59  ;;  %v457_v2 = vmul.f32 %v825_v60, %v1007_v32 }
 0x53b   :  { %v443_v63 = vpop.f32.mrf.mxu0 }
 0x53c   :  { %v456_v3 = vmul.f32 %v443_v63, %v997_v29  ;;  %v461_v4 = vadd.f32 %v459_v62, %v458_v1 }
 0x53e   :  { %v460_v5 = vadd.f32 %v457_v2, %v456_v3 }
 0x540   :  { %v462_v6 = vadd.f32 %v461_v4, %v460_v5 }
 0x542   :  { %831 = vmatmul.mubr.msk.f32.vlgmr.msra.gmra.mxu0 %vm153_vm2, %v462_v6 }
 0x543   :  { %837 = vmatprep.mubr.msk.f32.mxu0 %vm915_vm1, %v914_v8  ;;  %834 = vmatpush3.msra.mxu0 %v25_v13 }
 0x544   :  { %835 = vmatprep.subr.mxu0 %v914_v8 }
 0x545   :  { %836 = vmatpush3.msra.mxu0 %v24_v14 }
 0x602   :  { %v540_v24 = vpop.f32.mrf.mxu0 }
 0x603   :  { %v541_v25 = vadd.f32 %v756_v19, %v540_v24 }
 0x604   :  { %v832_v28 = vpop.f32.mrf.mxu0 }
 0x605   :  { %v544_v7 = vadd.f32 %v541_v25, %v937_v0  ;;  %v33_v0 = vld [vmem:[%s1135_s1 + $0x68] sm:$0xff] }
 0x606   :  { %841 = vmatpush3.msra.mxu1 %v33_v0 }
 0x607   :  { %v545_v32 = vsel %vm46_vm0, %v544_v7, 0.0  ;;  %842 = vmatprep.subr.mxu1 %v914_v8 }
 0x608   :  { %546 = vadd.xlane.f32.xlu0 %v545_v32  ;;  %843 = vmatpush3.msra.mxu1 %v32_v15 }
 0x609   :  { %844 = vmatprep.subr.mxu1 %v914_v8 }
 0x60a   :  { %845 = vmatpush3.msra.mxu1 %v31_v16 }
 0x60b   :  { %846 = vmatprep.subr.mxu1 %v914_v8 }
 0x60c   :  { %847 = vmatpush3.msra.mxu1 %v30_v17 }
 0x60d   :  { %848 = vmatprep.subr.mxu1 %v914_v8 }
 0x60e   :  { %849 = vmatpush3.msra.mxu1 %v29_v18 }
 0x60f   :  { %850 = vmatprep.subr.mxu1 %v914_v8 }
 0x610   :  { %851 = vmatpush3.msra.mxu1 %v28_v35 }
 0x611   :  { %852 = vmatprep.subr.mxu1 %v914_v8 }
 0x612   :  { %853 = vmatpush3.msra.mxu1 %v27_v36 }
 0x613   :  { %854 = vmatprep.subr.mxu1 %v914_v8 }
 0x614   :  { %855 = vmatpush3.msra.mxu1 %v26_v37 }
 0x691   :  { %v547_v29 = vpop.xlane.xlu0 %546 }
 0x692   :  { %v548_v9 = vmul.f32 0.0625, %v547_v29 }
 0x694   :  { %v549_v10 = vsub.f32 %v544_v7, %v548_v9 }
 0x696   :  { %v550_v11 = vmul.f32 %v549_v10, %v549_v10 }
 0x698   :  { %v551_v12 = vsel %vm46_vm0, %v550_v11, 0.0 }
 0x699   :  { %552 = vadd.xlane.f32.xlu0 %v551_v12 }
 0x722   :  { %v553_v21 = vpop.xlane.xlu0 %552 }
 0x723   :  { %v554_v22 = vmul.f32 0.0625, %v553_v21 }
 0x725   :  { %v555_v23 = vadd.f32 1e-05, %v554_v22 }
 0x727   :  { %890 = vrsqrt.f32 %v555_v23 }
 0x734   :  { %v891_v26 = vpop.eup %890 }
 0x735   :  { %v557_v30 = vmul.f32 %v891_v26, %v549_v10 }
 0x737   :  { %v562_v33 = vmul.f32 %v759_v27, %v557_v30 }
 0x739   :  { %v567_v34 = vadd.f32 %v760_v31, %v562_v33 }
 0x73b   :  { %838 = vmatmul.mubr.msk.f32.vlgmr.msra.gmra.mxu0 %vm46_vm0, %v567_v34 }
 0x7fb   :  { %v641_v39 = vpop.f32.mrf.mxu0 }
 0x7fc   :  { %v642_v40 = vadd.f32 %v761_v38, %v641_v39 }
 0x7fd   :  { %v839_v41 = vpop.f32.mrf.mxu0 }
 0x7fe   :  { %v645_v42 = vmax.f32 %v642_v40, 0.0 }
 0x800   :  { %857 = vmatmul.mubr.msk.f32.vlgmr.msra.gmra.mxu1 %vm650_vm5, %v645_v42 }
 0x8c0   :  { %v720_v43 = vpop.f32.mrf.mxu1 }
 0x8c1   :  { %v721_v44 = vadd.f32 %v763_v20, %v720_v43 }
 0x8c2   :  { %v858_v8 = vpop.f32.mrf.mxu1 }
 0x8c3   :  { %v724_v45 = vadd.f32 %v721_v44, %v544_v7 }
 0x8c5   :  { %725 = vst.msk [vmem:[#allocation2] sm:$0xff] %vm46_vm0, %v724_v45 }
 0x8c6   :  { %903 = shalt.err (!%p900_p4)
}
 0x8c7   :  { %735 = dma.vmem_to_hbm [thread:$0]  %s733_s21, 128, %s1136_s2, [#allocation3]  }
 0x8c8   :  { %912 = dma.done.wait [#allocation3], 128  }
 0x8c9   :  { %913 = vsyncadd [#allocation3], 4294967168 }
 0x8ca   :  { %739 = vsyncpa [#allocation3], 1 }

</bundles_post_ra>
